<compile_context>
chip_gen: v7x
topology: tpu7x:2x2x1
jax: 0.10.0
libtpu: 0.0.40
codegen_flags: <defaults>
</compile_context>

<pallas_src>
import functools

import jax
import jax.numpy as jnp
from jax import lax
from jax.experimental import pallas as pl
from jax.experimental.pallas import tpu as pltpu


def _state_trans_kernel(qT_ref, dqT_ref, w1_ref, w2_ref, bias_ref,
                        new_qT_ref, new_dqT_ref,
                        *, step_size, inv_mass, num_steps):
    """StateTrans update for one lane-dense (D, TB) batch tile.

    Weights / packed biases are full-extent blocks (VMEM-resident across the
    grid); `num_steps` updates are fused so state never leaves VMEM between
    steps.  Backward contractions multiply by W^T via dot_general over the
    weight's axis 0 -- no transposed weight copies are ever shipped.
    """
    w1 = w1_ref[...]          # (H, D)  f32 or bf16
    w2 = w2_ref[...]          # (H, H)  f32 or bf16
    b1 = bias_ref[:, 0:1]     # (H, 1)  f32
    b2 = bias_ref[:, 1:2]     # (H, 1)  f32
    s3 = bias_ref[:, 2:3]     # (H, 1)  f32  == column sums of W3 (W3^T @ 1)
    cdt = w1.dtype            # MXU operand dtype

    # Contract over the weight's axis 0  <=>  multiply by W^T.
    dn_t = (((0,), (0,)), ((), ()))

    def one_step(qT, dqT):
        # Forward MLP hidden activations; batch rides the 128-wide lane axis.
        h1 = jnp.tanh(jnp.dot(w1, qT.astype(cdt),
                              preferred_element_type=jnp.float32) + b1)      # (H, TB)
        h2 = jnp.tanh(jnp.dot(w2, h1.astype(cdt),
                              preferred_element_type=jnp.float32) + b2)      # (H, TB)
        # Analytic gradient of sum(trans(q)) w.r.t. q (b3 drops out).
        g2 = s3 * (1.0 - h2 * h2)                                            # (H, TB)
        g1 = lax.dot_general(w2, g2.astype(cdt), dn_t,
                             preferred_element_type=jnp.float32) * (1.0 - h1 * h1)
        dfdq = lax.dot_general(w1, g1.astype(cdt), dn_t,
                               preferred_element_type=jnp.float32)           # (D, TB)
        new_dq = dqT - (inv_mass * step_size) * dfdq
        new_q = qT + step_size * new_dq
        return new_q, new_dq

    qT = qT_ref[...].astype(jnp.float32)
    dqT = dqT_ref[...].astype(jnp.float32)
    if num_steps == 1:
        qT, dqT = one_step(qT, dqT)
    else:
        # Unroll short fused-step chains so the scheduler can overlap the
        # MXU/EUP/VPU dependence chains of adjacent steps.
        qT, dqT = lax.fori_loop(0, num_steps, lambda _, c: one_step(*c),
                                (qT, dqT), unroll=bool(num_steps <= 8))

    new_qT_ref[...] = qT.astype(new_qT_ref.dtype)
    new_dqT_ref[...] = dqT.astype(new_dqT_ref.dtype)


def _vmem_capacity():
    try:
        return int(pltpu.get_tpu_info().vmem_capacity_bytes)  # 64 MiB/TC v7x; 128 MiB v5e/v6e
    except Exception:
        return 64 << 20


def _round_up(x, m):
    return (x + m - 1) // m * m


def _pick_batch_tile(B, D, H):
    """Largest lane-dense batch tile that fits the generation's VMEM budget.

    Only the 4 state tiles (q, dq in; new_q, new_dq out) are double-buffered by
    the pipeline; h1/h2/g1/g2/dfdq are single-instance temps.  Once B >= 256 we
    guarantee >=2 grid tiles so the 'parallel' axis keeps both v7x TensorCores
    busy (and lets output DMA overlap compute on single-TC parts).
    """
    vmem_cap = _vmem_capacity()
    budget = vmem_cap // 3                       # headroom for weights/compiler temps/spill
    per_col = 4 * (4 * 2 * D + 4 * H + D)        # f32 bytes per batch column
    tb = (budget // per_col) // 128 * 128
    tb = int(max(128, min(tb, 32768)))           # high cap: 128 MiB parts want big tiles
    if B <= tb:
        if B >= 256:
            return _round_up(pl.cdiv(B, 2), 128)  # >=2 tiles, each a multiple of 128 lanes
        return B                                  # single full-extent block (any B allowed)
    return tb


def state_trans_batch_last(qT, dqT, step_size, params, mass=1.0, num_steps=1,
                           weight_dtype=None):
    """StateTrans update on batch-last state.

    qT, dqT: (input_dim, B) float32 -- preferred layout; feeding the outputs of
    one call into the next keeps the trajectory transpose-free in HBM.
    params: w1 (H,D), b1 (H,), w2 (H,H), b2 (H,), w3 (D,H), b3 (D,)
            (PyTorch nn.Linear layout: weight is (out_features, in_features)).
    weight_dtype: optionally jnp.bfloat16 for the compute-bound multi-step path
            on v6e/v7x (state and accumulation stay f32); default f32.
    """
    D, B = qT.shape
    H = params["w1"].shape[0]

    w1 = params["w1"]                             # (H, D)
    w2 = params["w2"]                             # (H, H)
    if weight_dtype is not None:
        w1 = w1.astype(weight_dtype)
        w2 = w2.astype(weight_dtype)
    # Pack b1, b2 and s3 = W3^T @ 1 into one small block (b3 never needed).
    bias_pack = jnp.stack(
        [params["b1"], params["b2"], jnp.sum(params["w3"], axis=0)],
        axis=1).astype(jnp.float32)               # (H, 3)

    tb = _pick_batch_tile(B, D, H)
    nb = pl.cdiv(B, tb)
    Bp = nb * tb
    if Bp != B:
        # Only triggers for ragged batch sizes (B not a multiple of the tile);
        # pick B < 256 or a multiple of 128 to avoid this pad entirely.
        qT = jnp.pad(qT, ((0, 0), (0, Bp - B)))
        dqT = jnp.pad(dqT, ((0, 0), (0, Bp - B)))

    kernel = functools.partial(
        _state_trans_kernel,
        step_size=float(step_size),               # compile-time constants
        inv_mass=1.0 / float(mass),
        num_steps=int(num_steps),
    )

    vmem_cap = _vmem_capacity()
    weight_bytes = (w1.size * w1.dtype.itemsize + w2.size * w2.dtype.itemsize
                    + _round_up(H, 8) * 128 * 4)          # bias pack, lane-padded
    state_bytes = 4 * 2 * D * tb * 4                      # 4 state tiles, double-buffered
    tmp_bytes = (4 * H + D) * tb * 4                      # h1,h2,g1,g2,dfdq (single instance)
    vmem_limit = int(min(max(32 << 20, 2 * (weight_bytes + state_bytes + tmp_bytes)),
                         (3 * vmem_cap) // 4))

    cost = pl.CostEstimate(
        flops=int(2 * num_steps * Bp * (2 * D * H + 2 * H * H)),
        transcendentals=int(2 * num_steps * Bp * H),
        bytes_accessed=int(4 * 4 * D * Bp + weight_bytes),   # state read+write + weights
    )

    batch_spec = pl.BlockSpec((D, tb), lambda i: (0, i))

    def full(shape):
        return pl.BlockSpec(shape, lambda i: (0, 0))

    new_qT, new_dqT = pl.pallas_call(
        kernel,
        out_shape=(jax.ShapeDtypeStruct((D, Bp), qT.dtype),
                   jax.ShapeDtypeStruct((D, Bp), dqT.dtype)),
        grid_spec=pltpu.PrefetchScalarGridSpec(
            num_scalar_prefetch=0,
            grid=(nb,),
            in_specs=[
                batch_spec, batch_spec,            # q^T, dq^T
                full((H, D)), full((H, H)),        # W1, W2 (no transposed copies)
                full((H, 3)),                      # [b1 | b2 | s3]
            ],
            out_specs=(batch_spec, batch_spec),
        ),
        compiler_params=pltpu.CompilerParams(
            dimension_semantics=("parallel",),     # shards batch tiles across TCs on v7x
            vmem_limit_bytes=vmem_limit,
        ),
        cost_estimate=cost,
    )(qT, dqT, w1, w2, bias_pack)

    if Bp != B:
        new_qT = new_qT[:, :B]
        new_dqT = new_dqT[:, :B]
    return new_qT, new_dqT


def state_trans(q, dq, step_size, params, mass=1.0, num_steps=1, weight_dtype=None):
    """(B, D) interface matching PyTorch StateTrans.forward.

    Transposes only at this call boundary; for integration loops prefer
    `state_trans_batch_last` and keep the state batch-last end-to-end.
    """
    new_qT, new_dqT = state_trans_batch_last(
        jnp.transpose(q), jnp.transpose(dq), step_size, params,
        mass=mass, num_steps=num_steps, weight_dtype=weight_dtype)
    return jnp.transpose(new_qT), jnp.transpose(new_dqT)


def _init_params(key, input_dim, hidden_dim):
    """Deterministic init mimicking nn.Linear default (uniform +/- 1/sqrt(fan_in))."""
    ks = jax.random.split(key, 6)

    def lin(kw, kb, fan_in, fan_out):
        bound = 1.0 / jnp.sqrt(fan_in)
        w = jax.random.uniform(kw, (fan_out, fan_in), jnp.float32, -bound, bound)
        b = jax.random.uniform(kb, (fan_out,), jnp.float32, -bound, bound)
        return w, b

    w1, b1 = lin(ks[0], ks[1], input_dim, hidden_dim)
    w2, b2 = lin(ks[2], ks[3], hidden_dim, hidden_dim)
    w3, b3 = lin(ks[4], ks[5], hidden_dim, input_dim)
    return {"w1": w1, "b1": b1, "w2": w2, "b2": b2, "w3": w3, "b3": b3}


def _reference(q, dq, step_size, params, mass=1.0):
    """Pure-JAX reference using autodiff, mirroring torch.autograd.grad."""
    def trans_sum(x):
        h1 = jnp.tanh(x @ params["w1"].T + params["b1"])
        h2 = jnp.tanh(h1 @ params["w2"].T + params["b2"])
        out = h2 @ params["w3"].T + params["b3"]
        return jnp.sum(out)

    dfdq = jax.grad(trans_sum)(q)
    new_dq = dq - (1.0 / mass) * step_size * dfdq
    new_q = q + step_size * new_dq
    return new_q, new_dq


if __name__ == "__main__":
    D, H = 16, 32          # input_dim, hidden_dim
    mass = 1.0
    step_size = 0.1

    key = jax.random.PRNGKey(0)
    k_p, k_q, k_dq, k_q2, k_dq2 = jax.random.split(key, 5)
    params = _init_params(k_p, D, H)

    # --- Small batch, single step: matches the PyTorch module's forward. ---
    B = 8
    q = jax.random.normal(k_q, (B, D), dtype=jnp.float32)
    dq = jax.random.normal(k_dq, (B, D), dtype=jnp.float32)
    new_q, new_dq = state_trans(q, dq, step_size, params, mass=mass)
    jax.block_until_ready((new_q, new_dq))
    ref_q, ref_dq = _reference(q, dq, step_size, params, mass=mass)
    assert jnp.allclose(new_q, ref_q, atol=1e-5, rtol=1e-5)
    assert jnp.allclose(new_dq, ref_dq, atol=1e-5, rtol=1e-5)

    # --- Larger batch, fused multi-step, batch-last end-to-end (multi-tile grid). ---
    B2 = 512
    q2 = jax.random.normal(k_q2, (B2, D), dtype=jnp.float32)
    dq2 = jax.random.normal(k_dq2, (B2, D), dtype=jnp.float32)
    qT, dqT = jnp.transpose(q2), jnp.transpose(dq2)   # once, at the trajectory boundary
    n_steps = 4
    mqT, mdqT = state_trans_batch_last(qT, dqT, step_size, params, mass=mass,
                                       num_steps=n_steps)
    jax.block_until_ready((mqT, mdqT))
    rq, rdq = q2, dq2
    for _ in range(n_steps):
        rq, rdq = _reference(rq, rdq, step_size, params, mass=mass)
    assert jnp.allclose(jnp.transpose(mqT), rq, atol=1e-4, rtol=1e-4)
    assert jnp.allclose(jnp.transpose(mdqT), rdq, atol=1e-4, rtol=1e-4)

    # --- bf16 weights (compute-bound multi-step path on v6e/v7x); loose check. ---
    bqT, bdqT = state_trans_batch_last(qT, dqT, step_size, params, mass=mass,
                                       num_steps=n_steps, weight_dtype=jnp.bfloat16)
    jax.block_until_ready((bqT, bdqT))
    assert jnp.allclose(jnp.transpose(bqT), rq, atol=5e-2, rtol=5e-2)
    assert jnp.allclose(jnp.transpose(bdqT), rdq, atol=5e-2, rtol=5e-2)

    print("KERNEL_OK")
</pallas_src>

<mosaic_0001>
module attributes {stable_mosaic.version = 11 : i64} {
  func.func @_state_trans_kernel(%arg0: i32, %arg1: memref<16x8xf32, #tpu.memory_space<vmem>>, %arg2: memref<16x8xf32, #tpu.memory_space<vmem>>, %arg3: memref<32x16xf32, #tpu.memory_space<vmem>>, %arg4: memref<32x32xf32, #tpu.memory_space<vmem>>, %arg5: memref<32x3xf32, #tpu.memory_space<vmem>>, %arg6: memref<16x8xf32, #tpu.memory_space<vmem>>, %arg7: memref<16x8xf32, #tpu.memory_space<vmem>>) attributes {dimension_semantics = [#tpu.dimension_semantics<parallel>], iteration_bounds = array<i64: 1>, scalar_prefetch = 0 : i64, scratch_operands = 0 : i64, tpu.core_type = #tpu.core_type<tc>, window_params = [{transform_indices = @transform_0, window_bounds = array<i64: 16, 8>}, {transform_indices = @transform_1, window_bounds = array<i64: 16, 8>}, {pipeline_mode = #tpu.pipeline_mode<synchronous>, transform_indices = @transform_2, window_bounds = array<i64: 32, 16>}, {pipeline_mode = #tpu.pipeline_mode<synchronous>, transform_indices = @transform_3, window_bounds = array<i64: 32, 32>}, {pipeline_mode = #tpu.pipeline_mode<synchronous>, transform_indices = @transform_4, window_bounds = array<i64: 32, 3>}, {transform_indices = @transform_5, window_bounds = array<i64: 16, 8>}, {transform_indices = @transform_6, window_bounds = array<i64: 16, 8>}]} {
    %c0 = arith.constant 0 : index
    %c0_0 = arith.constant 0 : index
    %0 = vector.load %arg3[%c0, %c0_0] : memref<32x16xf32, #tpu.memory_space<vmem>>, vector<32x16xf32>
    %c0_1 = arith.constant 0 : index
    %c0_2 = arith.constant 0 : index
    %1 = vector.load %arg4[%c0_1, %c0_2] : memref<32x32xf32, #tpu.memory_space<vmem>>, vector<32x32xf32>
    %c0_3 = arith.constant 0 : index
    %c0_4 = arith.constant 0 : index
    %2 = vector.load %arg5[%c0_3, %c0_4] : memref<32x3xf32, #tpu.memory_space<vmem>>, vector<32x1xf32>
    %c0_5 = arith.constant 0 : index
    %c1 = arith.constant 1 : index
    %3 = vector.load %arg5[%c0_5, %c1] : memref<32x3xf32, #tpu.memory_space<vmem>>, vector<32x1xf32>
    %c0_6 = arith.constant 0 : index
    %c2 = arith.constant 2 : index
    %4 = vector.load %arg5[%c0_6, %c2] : memref<32x3xf32, #tpu.memory_space<vmem>>, vector<32x1xf32>
    %c0_7 = arith.constant 0 : index
    %c0_8 = arith.constant 0 : index
    %5 = vector.load %arg1[%c0_7, %c0_8] : memref<16x8xf32, #tpu.memory_space<vmem>>, vector<16x8xf32>
    %c0_9 = arith.constant 0 : index
    %c0_10 = arith.constant 0 : index
    %6 = vector.load %arg2[%c0_9, %c0_10] : memref<16x8xf32, #tpu.memory_space<vmem>>, vector<16x8xf32>
    %cst = arith.constant dense<0.000000e+00> : vector<32x8xf32>
    %7 = tpu.matmul %0, %5, %cst {dimension_numbers = #tpu.dot_dimension_numbers<[1], [0], [0], [1], [0, 0, 1, 1], [], []>} : vector<32x16xf32>, vector<16x8xf32>, vector<32x8xf32> -> vector<32x8xf32>
    %8 = vector.broadcast %2 : vector<32x1xf32> to vector<32x8xf32>
    %9 = arith.addf %7, %8 : vector<32x8xf32>
    %10 = math.tanh %9 : vector<32x8xf32>
    %cst_11 = arith.constant dense<0.000000e+00> : vector<32x8xf32>
    %11 = tpu.matmul %1, %10, %cst_11 {dimension_numbers = #tpu.dot_dimension_numbers<[1], [0], [0], [1], [0, 0, 1, 1], [], []>} : vector<32x32xf32>, vector<32x8xf32>, vector<32x8xf32> -> vector<32x8xf32>
    %12 = vector.broadcast %3 : vector<32x1xf32> to vector<32x8xf32>
    %13 = arith.addf %11, %12 : vector<32x8xf32>
    %14 = math.tanh %13 : vector<32x8xf32>
    %15 = arith.mulf %14, %14 : vector<32x8xf32>
    %cst_12 = arith.constant 1.000000e+00 : f32
    %16 = vector.broadcast %cst_12 : f32 to vector<32x8xf32>
    %17 = arith.subf %16, %15 : vector<32x8xf32>
    %18 = vector.broadcast %4 : vector<32x1xf32> to vector<32x8xf32>
    %19 = arith.mulf %18, %17 : vector<32x8xf32>
    %cst_13 = arith.constant dense<0.000000e+00> : vector<32x8xf32>
    %20 = tpu.matmul %1, %19, %cst_13 {dimension_numbers = #tpu.dot_dimension_numbers<[0], [0], [1], [1], [0, 1, 1, 1], [], []>} : vector<32x32xf32>, vector<32x8xf32>, vector<32x8xf32> -> vector<32x8xf32>
    %21 = arith.mulf %10, %10 : vector<32x8xf32>
    %cst_14 = arith.constant 1.000000e+00 : f32
    %22 = vector.broadcast %cst_14 : f32 to vector<32x8xf32>
    %23 = arith.subf %22, %21 : vector<32x8xf32>
    %24 = arith.mulf %20, %23 : vector<32x8xf32>
    %cst_15 = arith.constant dense<0.000000e+00> : vector<16x8xf32>
    %25 = tpu.matmul %0, %24, %cst_15 {dimension_numbers = #tpu.dot_dimension_numbers<[0], [0], [1], [1], [0, 1, 1, 1], [], []>} : vector<32x16xf32>, vector<32x8xf32>, vector<16x8xf32> -> vector<16x8xf32>
    %cst_16 = arith.constant 1.000000e-01 : f32
    %26 = vector.broadcast %cst_16 : f32 to vector<16x8xf32>
    %27 = arith.mulf %26, %25 : vector<16x8xf32>
    %28 = arith.subf %6, %27 : vector<16x8xf32>
    %cst_17 = arith.constant 1.000000e-01 : f32
    %29 = vector.broadcast %cst_17 : f32 to vector<16x8xf32>
    %30 = arith.mulf %29, %28 : vector<16x8xf32>
    %31 = arith.addf %5, %30 : vector<16x8xf32>
    %c0_18 = arith.constant 0 : index
    %c0_19 = arith.constant 0 : index
    %32 = vector.load %arg6[%c0_18, %c0_19] : memref<16x8xf32, #tpu.memory_space<vmem>>, vector<16x8xf32>
    tpu.vector_store %arg6[%c0_18, %c0_19], %31 {strides = array<i32>} : memref<16x8xf32, #tpu.memory_space<vmem>>, vector<16x8xf32>,
    %c0_20 = arith.constant 0 : index
    %c0_21 = arith.constant 0 : index
    %33 = vector.load %arg7[%c0_20, %c0_21] : memref<16x8xf32, #tpu.memory_space<vmem>>, vector<16x8xf32>
    tpu.vector_store %arg7[%c0_20, %c0_21], %28 {strides = array<i32>} : memref<16x8xf32, #tpu.memory_space<vmem>>, vector<16x8xf32>,
    return
  }
  func.func @transform_0(%arg0: i32) -> (i32, i32) {
    %c0_i32 = arith.constant 0 : i32
    %c0_i32_0 = arith.constant 0 : i32
    return %c0_i32, %arg0 : i32, i32
  }
  func.func @transform_1(%arg0: i32) -> (i32, i32) {
    %c0_i32 = arith.constant 0 : i32
    %c0_i32_0 = arith.constant 0 : i32
    return %c0_i32, %arg0 : i32, i32
  }
  func.func @transform_2(%arg0: i32) -> (i32, i32) {
    %c0_i32 = arith.constant 0 : i32
    %c0_i32_0 = arith.constant 0 : i32
    %c0_i32_1 = arith.constant 0 : i32
    return %c0_i32, %c0_i32_0 : i32, i32
  }
  func.func @transform_3(%arg0: i32) -> (i32, i32) {
    %c0_i32 = arith.constant 0 : i32
    %c0_i32_0 = arith.constant 0 : i32
    %c0_i32_1 = arith.constant 0 : i32
    return %c0_i32, %c0_i32_0 : i32, i32
  }
  func.func @transform_4(%arg0: i32) -> (i32, i32) {
    %c0_i32 = arith.constant 0 : i32
    %c0_i32_0 = arith.constant 0 : i32
    %c0_i32_1 = arith.constant 0 : i32
    return %c0_i32, %c0_i32_0 : i32, i32
  }
  func.func @transform_5(%arg0: i32) -> (i32, i32) {
    %c0_i32 = arith.constant 0 : i32
    %c0_i32_0 = arith.constant 0 : i32
    return %c0_i32, %arg0 : i32, i32
  }
  func.func @transform_6(%arg0: i32) -> (i32, i32) {
    %c0_i32 = arith.constant 0 : i32
    %c0_i32_0 = arith.constant 0 : i32
    return %c0_i32, %arg0 : i32, i32
  }
}

</mosaic_0001>

<bundles_post_ra>
// kernel: tpu_custom_call.1
= control target key start
LH: loop header
LB: loop body
LE: loop exit
PB: predicated region body
PF: predicated region fallthrough
CT: control target
= control target key end

     0   :  { %vm58_vm0 = vcmask 130048   ;;  %v726_v3 = vmov 0   ;;  %vm176_vm1 = vcmask 261120   ;;  %v727_v13 = vmov 1   ;;  %s866_s0 = inlined_call_operand.vmem [shape: f32[16,8], index: 0, kind: input, shape index: {}]   ;;  %s867_s2 = inlined_call_operand.vmem [shape: f32[32,16], index: 2, kind: input, shape index: {}]   ;;  %s868_s4 = inlined_call_operand.vmem [shape: f32[32,3], index: 4, kind: input, shape index: {}]   ;;  %s869_s3 = inlined_call_operand.vmem [shape: f32[32,32], index: 3, kind: input, shape index: {}]   ;;  %s870_s1 = inlined_call_operand.vmem [shape: f32[16,8], index: 1, kind: input, shape index: {}]   ;;  %s871_s6 = inlined_call_operand.vmem [shape: f32[16,8], index: 6, kind: output, shape index: {1}]   ;;  %s872_s5 = inlined_call_operand.vmem [shape: f32[16,8], index: 5, kind: output, shape index: {0}]  }
   0x1   :  { %v767_v0 = vld [vmem:[%s866_s0] sm:$0xff]  ;;  %v772_v1 = vld [vmem:[%s866_s0 + $0x8] sm:$0xff]  ;;  %704 = vset.pattern.permute.xlu0 %v726_v3  ;;  %705 = vset.pattern.permute.xlu1 %v726_v3  ;;  %v32_v6 = vld [vmem:[%s868_s4 + $0x10] sm:$0xff]  ;;  %v728_v14 = vmov 2   ;;  %vm568_vm2 = vcmask 64512  }
   0x2   :  { %v22_v2 = vld [vmem:[%s867_s2] sm:$0xff]  ;;  %v672_v4 = vpack.c.bf16 %v772_v1, %v767_v0  ;;  %v23_v7 = vld [vmem:[%s867_s2 + $0x8] sm:$0xff]  ;;  %50 = vperm.xlu1 %705, %v32_v6   ;;  %v24_v9 = vld [vmem:[%s867_s2 + $0x10] sm:$0xff] }
   0x3   :  { %627 = vmatprep.mubr.msk.f32.mxu0 %vm58_vm0, %v22_v2  ;;  %v30_v5 = vld [vmem:[%s868_s4] sm:$0xff]  ;;  %v31_v8 = vld [vmem:[%s868_s4 + $0x8] sm:$0xff]  ;;  %v33_v10 = vld [vmem:[%s868_s4 + $0x18] sm:$0xff] }
   0x4   :  { %673 = vmatprep.subr.bf16.mxu0 %v672_v4  ;;  %40 = vperm.xlu0 %704, %v30_v5   ;;  %v25_v11 = vld [vmem:[%s867_s2 + $0x18] sm:$0xff]  ;;  %v26_v12 = vld [vmem:[%s869_s3] sm:$0xff]  ;;  %v27_v15 = vld [vmem:[%s869_s3 + $0x8] sm:$0xff] }
   0x5   :  { %675 = vmatpush3.bf16.msra.mxu0 %v672_v4  ;;  %641 = vmatprep.mubr.msk.f32.mxu1 %vm176_vm1, %v26_v12  ;;  %v28_v16 = vld [vmem:[%s869_s3 + $0x10] sm:$0xff]  ;;  %v29_v17 = vld [vmem:[%s869_s3 + $0x18] sm:$0xff] }
   0x6   :  { %55 = vperm.xlu1 %705, %v33_v10  }
   0x8   :  { %628 = vmatmul.mubr.msk.f32.vlgmr.msra.gmra.mrb[0].mxu0 %vm58_vm0, %v23_v7  ;;  %45 = vperm.xlu0 %704, %v31_v8  }
   0x9   :  { %630 = vmatprep.mubr.msk.f32.mxu0 %vm58_vm0, %v24_v9 }
   0xa   :  { %707 = vset.pattern.permute.xlu1 %v727_v13 }
   0xb   :  { %165 = vperm.xlu1 %707, %v31_v8  }
   0xc   :  { %631 = vmatmul.mubr.msk.f32.gmra.mrb[2].mxu0 %vm58_vm0, %v25_v11  ;;  %706 = vset.pattern.permute.xlu0 %v727_v13 }
   0xd   :  { %161 = vperm.xlu0 %706, %v30_v5  }
   0xf   :  { %169 = vperm.xlu1 %707, %v32_v6  }
  0x11   :  { %173 = vperm.xlu0 %706, %v33_v10  }
  0x13   :  { %708 = vset.pattern.permute.xlu1 %v728_v14 }
  0x14   :  { %287 = vperm.xlu1 %708, %v30_v5  }
  0x15   :  { %709 = vset.pattern.permute.xlu0 %v728_v14 }
  0x16   :  { %291 = vperm.xlu0 %709, %v31_v8  }
  0x18   :  { %295 = vperm.xlu1 %708, %v32_v6  }
  0x1c   :  { %299 = vperm.xlu1 %708, %v33_v10  }
  0x34   :  { %306 = vxpose.xlu0.b32.start [1/4] (short) (narrow) %v26_v12, 32 }
  0x38   :  { %307 = vxpose.xlu0.b32.cont [2/4] (short) (narrow) %v27_v15, 32 }
  0x3c   :  { %308 = vxpose.xlu0.b32.cont [3/4] (short) (narrow) %v28_v16, 32 }
  0x40   :  { %309 = vxpose.xlu0.b32.end [4/4] (short) (narrow) %v29_v17, 32 }
  0x45   :  { %447 = vxpose.xlu1.b32.start [1/4] (short) (narrow) %v22_v2, 16 }
  0x49   :  { %448 = vxpose.xlu1.b32.cont [2/4] (short) (narrow) %v23_v7, 16 }
  0x4d   :  { %449 = vxpose.xlu1.b32.cont [3/4] (short) (narrow) %v24_v9, 16 }
  0x51   :  { %450 = vxpose.xlu1.b32.end [4/4] (short) (narrow) %v25_v11, 16 }
  0x81   :  { %v51_v19 = vpop.permute.xlu1 %50 }
  0x83   :  { %v41_v18 = vpop.permute.xlu0 %40 }
  0x85   :  { %v56_v25 = vpop.permute.xlu1 %55 }
  0x87   :  { %v46_v20 = vpop.permute.xlu0 %45 }
  0x8a   :  { %v166_v40 = vpop.permute.xlu1 %165 }
  0x8c   :  { %v162_v36 = vpop.permute.xlu0 %161 }
  0x8e   :  { %v170_v45 = vpop.permute.xlu1 %169 }
  0x90   :  { %v174_v37 = vpop.permute.xlu0 %173 }
  0x93   :  { %v288_v50 = vpop.permute.xlu1 %287 }
  0x95   :  { %v292_v38 = vpop.permute.xlu0 %291 }
  0x97   :  { %v296_v55 = vpop.permute.xlu1 %295 }
  0x9b   :  { %v300_v6 = vpop.permute.xlu1 %299 }
  0xb4   :  { %v322_v39 = vpop.trf.xlu0 }
  0xb5   :  { %655 = vmatprep.mubr.msk.f32.mxu0 %vm176_vm1, %v322_v39 }
  0xb8   :  { %v323_v3 = vpop.trf.xlu0 }
  0xbc   :  { %v324_v10 = vpop.trf.xlu0 }
  0xc0   :  { %v325_v11 = vpop.trf.xlu0 }
  0xc5   :  { %v463_v12 = vpop.trf.xlu1 }
  0xdb   :  { %v629_v21 = vpop.f32.mrb[0].mxu0 }
  0xdc   :  { %v143_v22 = vadd.f32 %v629_v21, %v46_v20  ;;  %v137_v23 = vpop.f32.mrb[1].mxu0 }
  0xdd   :  { %v138_v24 = vadd.f32 %v137_v23, %v41_v18 }
  0xde   :  { %710 = vtanh.f32 %v143_v22 }
  0xdf   :  { %712 = vtanh.f32 %v138_v24  ;;  %v632_v26 = vpop.f32.mrb[2].mxu0 }
  0xe0   :  { %v153_v27 = vadd.f32 %v632_v26, %v56_v25  ;;  %v147_v28 = vpop.f32.mrb[3].mxu0 }
  0xe1   :  { %v148_v29 = vadd.f32 %v147_v28, %v51_v19 }
  0xe2   :  { %714 = vtanh.f32 %v153_v27 }
  0xe3   :  { %716 = vtanh.f32 %v148_v29 }
  0xe8   :  { %v817_v30 = vpop.eup %710 }
  0xe9   :  { %v819_v31 = vpop.eup %712  ;;  %v436_v13 = vmul.f32 %v817_v30, %v817_v30 }
  0xea   :  { %v676_v32 = vpack.c.bf16 %v817_v30, %v819_v31  ;;  %v435_v14 = vmul.f32 %v819_v31, %v819_v31  ;;  %v464_v31 = vpop.trf.xlu1 }
  0xec   :  { %v823_v33 = vpop.eup %714  ;;  %677 = vmatprep.subr.bf16.mxu1 %v676_v32  ;;  %v439_v18 = vsub.f32 1.0, %v435_v14 }
  0xed   :  { %v825_v34 = vpop.eup %716  ;;  %679 = vmatpush3.bf16.msra.mxu1 %v676_v32  ;;  %v37_v32 = vld [vmem:[%s870_s1 + $0x8] sm:$0xff] }
  0xee   :  { %v680_v35 = vpack.c.bf16 %v823_v33, %v825_v34  ;;  %v437_v19 = vmul.f32 %v825_v34, %v825_v34 }
  0xf0   :  { %681 = vmatprep.subr.bf16.mxu1 %v680_v35  ;;  %v441_v26 = vsub.f32 1.0, %v437_v19 }
  0xf1   :  { %683 = vmatpush3.bf16.msra.mxu1 %v680_v35  ;;  %v36_v35 = vld [vmem:[%s870_s1] sm:$0xff] }
  0xf4   :  { %642 = vmatmul.mubr.msk.f32.vlgmr.msra.gmra.mrb[0].mxu1 %vm176_vm1, %v27_v15  ;;  %v440_v15 = vsub.f32 1.0, %v436_v13 }
  0xf5   :  { %644 = vmatprep.mubr.msk.f32.mxu1 %vm176_vm1, %v28_v16  ;;  %v438_v16 = vmul.f32 %v823_v33, %v823_v33 }
  0xf7   :  { %v442_v23 = vsub.f32 1.0, %v438_v16 }
  0xf8   :  { %645 = vmatmul.mubr.msk.f32.gmra.mrb[2].mxu1 %vm176_vm1, %v29_v17 }
  0xf9   :  { %669 = vmatprep.mubr.msk.f32.mxu1 %vm176_vm1, %v463_v12 }
 0x1c7   :  { %v643_v41 = vpop.f32.mrb[0].mxu1 }
 0x1c8   :  { %v261_v42 = vadd.f32 %v643_v41, %v166_v40  ;;  %v255_v43 = vpop.f32.mrb[1].mxu1 }
 0x1c9   :  { %v256_v44 = vadd.f32 %v255_v43, %v162_v36 }
 0x1ca   :  { %718 = vtanh.f32 %v261_v42 }
 0x1cb   :  { %720 = vtanh.f32 %v256_v44  ;;  %v646_v46 = vpop.f32.mrb[2].mxu1 }
 0x1cc   :  { %v271_v47 = vadd.f32 %v646_v46, %v174_v37  ;;  %v265_v48 = vpop.f32.mrb[3].mxu1 }
 0x1cd   :  { %v266_v49 = vadd.f32 %v265_v48, %v170_v45 }
 0x1ce   :  { %722 = vtanh.f32 %v271_v47 }
 0x1cf   :  { %724 = vtanh.f32 %v266_v49 }
 0x1d4   :  { %v719_v51 = vpop.eup %718 }
 0x1d5   :  { %v721_v52 = vpop.eup %720  ;;  %v279_v53 = vmul.f32 %v719_v51, %v719_v51 }
 0x1d6   :  { %v278_v54 = vmul.f32 %v721_v52, %v721_v52 }
 0x1d7   :  { %v283_v56 = vsub.f32 1.0, %v279_v53 }
 0x1d8   :  { %v723_v57 = vpop.eup %722  ;;  %v282_v58 = vsub.f32 1.0, %v278_v54 }
 0x1d9   :  { %v725_v59 = vpop.eup %724  ;;  %v303_v60 = vmul.f32 %v292_v38, %v283_v56  ;;  %v281_v61 = vmul.f32 %v723_v57, %v723_v57 }
 0x1da   :  { %v302_v62 = vmul.f32 %v288_v50, %v282_v58  ;;  %v280_v63 = vmul.f32 %v725_v59, %v725_v59 }
 0x1db   :  { %v285_v2 = vsub.f32 1.0, %v281_v61 }
 0x1dc   :  { %v684_v4 = vpack.c.bf16 %v303_v60, %v302_v62  ;;  %v284_v5 = vsub.f32 1.0, %v280_v63 }
 0x1dd   :  { %v305_v7 = vmul.f32 %v300_v6, %v285_v2 }
 0x1de   :  { %v304_v8 = vmul.f32 %v296_v55, %v284_v5  ;;  %685 = vmatprep.subr.bf16.mxu0 %v684_v4 }
 0x1df   :  { %687 = vmatpush3.bf16.msra.mxu0 %v684_v4 }
 0x1e0   :  { %v688_v9 = vpack.c.bf16 %v305_v7, %v304_v8 }
 0x1e2   :  { %689 = vmatprep.subr.bf16.mxu0 %v688_v9 }
 0x1e3   :  { %691 = vmatpush3.bf16.msra.mxu0 %v688_v9 }
 0x1e6   :  { %656 = vmatmul.mubr.msk.f32.vlgmr.msra.gmra.mrb[4].mxu0 %vm176_vm1, %v323_v3 }
 0x1e7   :  { %658 = vmatprep.mubr.msk.f32.mxu0 %vm176_vm1, %v324_v10 }
 0x1ea   :  { %659 = vmatmul.mubr.msk.f32.gmra.mrb[6].mxu0 %vm176_vm1, %v325_v11 }
 0x2b9   :  { %v657_v17 = vpop.f32.mrb[4].mxu0 }
 0x2ba   :  { %v444_v20 = vmul.f32 %v657_v17, %v440_v15  ;;  %v416_v21 = vpop.f32.mrb[5].mxu0 }
 0x2bb   :  { %v443_v22 = vmul.f32 %v439_v18, %v416_v21 }
 0x2bd   :  { %v692_v24 = vpack.c.bf16 %v444_v20, %v443_v22  ;;  %v660_v25 = vpop.f32.mrb[6].mxu0 }
 0x2be   :  { %v446_v27 = vmul.f32 %v660_v25, %v442_v23  ;;  %v426_v28 = vpop.f32.mrb[7].mxu0 }
 0x2bf   :  { %v445_v29 = vmul.f32 %v441_v26, %v426_v28  ;;  %693 = vmatprep.subr.bf16.mxu1 %v692_v24 }
 0x2c0   :  { %695 = vmatpush3.bf16.msra.mxu1 %v692_v24 }
 0x2c1   :  { %v696_v30 = vpack.c.bf16 %v446_v27, %v445_v29 }
 0x2c3   :  { %697 = vmatprep.subr.bf16.mxu1 %v696_v30 }
 0x2c4   :  { %699 = vmatpush3.bf16.msra.mxu1 %v696_v30 }
 0x2c7   :  { %670 = vmatmul.mubr.msk.f32.vlgmr.msra.gmra.mrb[4].mxu1 %vm176_vm1, %v464_v31 }
 0x39a   :  { %v671_v33 = vpop.f32.mrb[4].mxu1 }
 0x39b   :  { %v561_v34 = vmul.f32 0.1, %v671_v33  ;;  %v551_v36 = vpop.f32.mrb[5].mxu1 }
 0x39c   :  { %v560_v37 = vmul.f32 0.1, %v551_v36 }
 0x39d   :  { %v563_v38 = vsub.f32 %v37_v32, %v561_v34 }
 0x39e   :  { %v562_v39 = vsub.f32 %v36_v35, %v560_v37 }
 0x39f   :  { %v565_v40 = vmul.f32 0.1, %v563_v38  ;;  %572 = vst.msk [vmem:[%s871_s6 + $0x8] sm:$0xff] %vm568_vm2, %v563_v38 }
 0x3a0   :  { %v564_v41 = vmul.f32 0.1, %v562_v39  ;;  %571 = vst.msk [vmem:[%s871_s6] sm:$0xff] %vm568_vm2, %v562_v39 }
 0x3a1   :  { %v567_v42 = vadd.f32 %v565_v40, %v772_v1 }
 0x3a2   :  { %v566_v43 = vadd.f32 %v564_v41, %v767_v0 }
 0x3a3   :  { %570 = vst.msk [vmem:[%s872_s5 + $0x8] sm:$0xff] %vm568_vm2, %v567_v42 }
 0x3a4   :  { %569 = vst.msk [vmem:[%s872_s5] sm:$0xff] %vm568_vm2, %v566_v43 }

</bundles_post_ra>
